<compile_context>
chip_gen: v5e
topology: v5e:2x2
jax: 0.10.0
libtpu: 0.0.40
codegen_flags: <defaults>
</compile_context>

<pallas_src>
import jax
import jax.numpy as jnp
from jax.experimental import pallas as pl
from jax.experimental.pallas import tpu as pltpu

LANE = 128          # TPU lane width: output feature dim padded to this
TILE_B = 512        # batch rows per grid step (clipped / rebalanced below)


def _round_up(v, m):
    return ((v + m - 1) // m) * m


def _pick_batch_tile(batch, tile_b):
    """Batch tile: full batch for tiny inputs, else a multiple of 16 that
    yields at least 2 grid steps (so both v7x TensorCores get work)."""
    if batch <= 16:
        return batch                       # block == full dim (allowed)
    tb = min(tile_b, _round_up(pl.cdiv(batch, 2), 16))
    return max(16, min(tb, _round_up(batch, 16)))


def _rnn_cell_kernel(x_ref, h_ref, wx_ref, wh_ref, b_ref, o_ref):
    # x_ref: (TB, I) bf16   h_ref: (TB, H) bf16
    # wx_ref: (I, Hp) bf16  wh_ref: (H, Hp) bf16   (K-major, lane-dense Hp)
    # b_ref: (1, Hp) f32    o_ref: (TB, Hp) f32
    z = jnp.dot(x_ref[...], wx_ref[...], preferred_element_type=jnp.float32)
    z = z + jnp.dot(h_ref[...], wh_ref[...], preferred_element_type=jnp.float32)
    o_ref[...] = jnp.tanh(z + b_ref[...]).astype(o_ref.dtype)


def _rnn_cell_kernel_zero_hidden(x_ref, wx_ref, b_ref, o_ref):
    # Specialized hidden == 0 path: half the MXU work, no hidden DMA.
    z = jnp.dot(x_ref[...], wx_ref[...], preferred_element_type=jnp.float32)
    o_ref[...] = jnp.tanh(z + b_ref[...]).astype(o_ref.dtype)


def rnn_cell_forward(x, weight, bias, hidden=None, tile_b=TILE_B):
    """x: (B, I) f32, weight: (H, I+H) f32 (PyTorch layout), bias: (H,) f32.

    Returns tanh(cat(x, hidden) @ weight.T + bias) as (B, H) f32.
    """
    B, I = x.shape
    H = weight.shape[0]
    assert weight.shape == (H, I + H) and bias.shape == (H,)

    h_pad = _round_up(H, LANE)
    pad = h_pad - H

    # One-time parameter prep (in a real model this is done once, not per
    # call): split the PyTorch-layout weight, transpose to K-major, zero-pad
    # the output dim to a lane multiple, cast to bf16 for the MXU.
    wx_t = jnp.pad(weight[:, :I].T, ((0, 0), (0, pad))).astype(jnp.bfloat16)   # (I, Hp)
    b2 = jnp.pad(bias.reshape(1, H), ((0, 0), (0, pad)))                        # (1, Hp) f32

    x_b = x.astype(jnp.bfloat16)

    tb = _pick_batch_tile(B, tile_b)
    grid_b = pl.cdiv(B, tb)

    if hidden is None:
        # Zero-state path: no zeros(B, H) in HBM, no recurrent matmul.
        k_total = I
        operands = (x_b, wx_t, b2)
        in_specs = [
            pl.BlockSpec((tb, I), lambda i: (i, 0)),          # x tile (streamed)
            pl.BlockSpec((I, h_pad), lambda i: (0, 0)),       # Wx: VMEM-resident
            pl.BlockSpec((1, h_pad), lambda i: (0, 0)),       # bias: resident
        ]
        kernel = _rnn_cell_kernel_zero_hidden
        stream_tile_bytes = tb * I * 2
        weight_bytes = I * h_pad * 2
    else:
        wh_t = jnp.pad(weight[:, I:].T, ((0, 0), (0, pad))).astype(jnp.bfloat16)  # (H, Hp)
        h_b = hidden.astype(jnp.bfloat16)
        k_total = I + H
        operands = (x_b, h_b, wx_t, wh_t, b2)
        in_specs = [
            pl.BlockSpec((tb, I), lambda i: (i, 0)),          # x tile
            pl.BlockSpec((tb, H), lambda i: (i, 0)),          # hidden tile
            pl.BlockSpec((I, h_pad), lambda i: (0, 0)),       # Wx: resident
            pl.BlockSpec((H, h_pad), lambda i: (0, 0)),       # Wh: resident
            pl.BlockSpec((1, h_pad), lambda i: (0, 0)),       # bias: resident
        ]
        kernel = _rnn_cell_kernel
        stream_tile_bytes = tb * (I + H) * 2
        weight_bytes = (I + H) * h_pad * 2

    cost = pl.CostEstimate(
        flops=2 * B * k_total * h_pad,
        transcendentals=B * h_pad,
        bytes_accessed=(2 * B * k_total          # bf16 activations in
                        + weight_bytes           # bf16 weights in
                        + 4 * h_pad              # f32 bias in
                        + 4 * B * h_pad),        # f32 output
    )

    # VMEM budget: double-buffered streamed tiles + double-buffered output
    # tile + (default double-buffered) resident weights/bias, plus slack.
    vmem_needed = (2 * (stream_tile_bytes + tb * h_pad * 4)
                   + 2 * (weight_bytes + h_pad * 4)
                   + (2 << 20))
    vmem_limit = int(min(max(vmem_needed, 32 << 20), 64 << 20))

    out = pl.pallas_call(
        kernel,
        out_shape=jax.ShapeDtypeStruct((B, h_pad), jnp.float32),
        grid=(grid_b,),
        in_specs=in_specs,
        out_specs=pl.BlockSpec((tb, h_pad), lambda i: (i, 0)),
        compiler_params=pltpu.CompilerParams(
            dimension_semantics=("parallel",),     # megacore sharding on v7x
            vmem_limit_bytes=vmem_limit,
        ),
        cost_estimate=cost,
    )(*operands)

    # TODO(synk): callers that can consume the lane-dense padded layout should
    # skip this slice (extra B*h_pad read + B*H write); kept here to match the
    # nn.Module's (B, H) contract exactly.
    return out[:, :H] if pad else out


if __name__ == "__main__":
    batch = 2
    input_size = 16
    hidden_size = 32

    key = jax.random.PRNGKey(0)
    kx, kw, kb, kh = jax.random.split(key, 4)

    x = jax.random.normal(kx, (batch, input_size), dtype=jnp.float32)
    # nn.Linear(input_size + hidden_size, hidden_size): W (H, I+H), b (H,)
    bound = 1.0 / jnp.sqrt(float(input_size + hidden_size))
    weight = jax.random.uniform(
        kw, (hidden_size, input_size + hidden_size),
        minval=-bound, maxval=bound, dtype=jnp.float32)
    bias = jax.random.uniform(
        kb, (hidden_size,), minval=-bound, maxval=bound, dtype=jnp.float32)

    # Path 1: hidden=None (module default) -> specialized zero-state kernel.
    out0 = jax.block_until_ready(rnn_cell_forward(x, weight, bias, hidden=None))

    # Path 2: explicit hidden state -> full recurrent kernel.
    hidden = jax.random.normal(kh, (batch, hidden_size), dtype=jnp.float32)
    out1 = jax.block_until_ready(rnn_cell_forward(x, weight, bias, hidden=hidden))

    # Pure-JAX f32 reference (PyTorch semantics). bf16 MXU operands with f32
    # accumulation => tolerance ~1e-2 instead of the f32 1e-5.
    ref0 = jnp.tanh(
        jnp.concatenate([x, jnp.zeros((batch, hidden_size), jnp.float32)], -1)
        @ weight.T + bias)
    ref1 = jnp.tanh(jnp.concatenate([x, hidden], -1) @ weight.T + bias)

    assert out0.shape == (batch, hidden_size)
    assert out1.shape == (batch, hidden_size)
    assert jnp.allclose(out0, ref0, atol=1e-2, rtol=1e-2)
    assert jnp.allclose(out1, ref1, atol=1e-2, rtol=1e-2)

    print("KERNEL_OK")
</pallas_src>

<mosaic_0001>
module attributes {stable_mosaic.version = 11 : i64} {
  func.func @_rnn_cell_kernel_zero_hidden(%arg0: i32, %arg1: memref<2x16xbf16, #tpu.memory_space<vmem>>, %arg2: memref<16x128xbf16, #tpu.memory_space<vmem>>, %arg3: memref<1x128xf32, #tpu.memory_space<vmem>>, %arg4: memref<2x128xf32, #tpu.memory_space<vmem>>) attributes {dimension_semantics = [#tpu.dimension_semantics<parallel>], iteration_bounds = array<i64: 1>, scalar_prefetch = 0 : i64, scratch_operands = 0 : i64, tpu.core_type = #tpu.core_type<tc>, window_params = [{transform_indices = @transform_0, window_bounds = array<i64: 2, 16>}, {pipeline_mode = #tpu.pipeline_mode<synchronous>, transform_indices = @transform_1, window_bounds = array<i64: 16, 128>}, {pipeline_mode = #tpu.pipeline_mode<synchronous>, transform_indices = @transform_2, window_bounds = array<i64: 1, 128>}, {transform_indices = @transform_3, window_bounds = array<i64: 2, 128>}]} {
    %c0 = arith.constant 0 : index
    %c0_0 = arith.constant 0 : index
    %0 = vector.load %arg1[%c0, %c0_0] : memref<2x16xbf16, #tpu.memory_space<vmem>>, vector<2x16xbf16>
    %c0_1 = arith.constant 0 : index
    %c0_2 = arith.constant 0 : index
    %1 = vector.load %arg2[%c0_1, %c0_2] : memref<16x128xbf16, #tpu.memory_space<vmem>>, vector<16x128xbf16>
    %cst = arith.constant dense<0.000000e+00> : vector<2x128xf32>
    %2 = tpu.matmul %0, %1, %cst {dimension_numbers = #tpu.dot_dimension_numbers<[1], [0], [0], [1], [0, 0, 1, 1], [], []>} : vector<2x16xbf16>, vector<16x128xbf16>, vector<2x128xf32> -> vector<2x128xf32>
    %c0_3 = arith.constant 0 : index
    %c0_4 = arith.constant 0 : index
    %3 = vector.load %arg3[%c0_3, %c0_4] : memref<1x128xf32, #tpu.memory_space<vmem>>, vector<1x128xf32>
    %4 = vector.broadcast %3 : vector<1x128xf32> to vector<2x128xf32>
    %5 = arith.addf %2, %4 : vector<2x128xf32>
    %6 = math.tanh %5 : vector<2x128xf32>
    %c0_5 = arith.constant 0 : index
    %c0_6 = arith.constant 0 : index
    %7 = vector.load %arg4[%c0_5, %c0_6] : memref<2x128xf32, #tpu.memory_space<vmem>>, vector<2x128xf32>
    tpu.vector_store %arg4[%c0_5, %c0_6], %6 {strides = array<i32>} : memref<2x128xf32, #tpu.memory_space<vmem>>, vector<2x128xf32>,
    return
  }
  func.func @transform_0(%arg0: i32) -> (i32, i32) {
    %c0_i32 = arith.constant 0 : i32
    %c0_i32_0 = arith.constant 0 : i32
    return %arg0, %c0_i32 : i32, i32
  }
  func.func @transform_1(%arg0: i32) -> (i32, i32) {
    %c0_i32 = arith.constant 0 : i32
    %c0_i32_0 = arith.constant 0 : i32
    %c0_i32_1 = arith.constant 0 : i32
    return %c0_i32, %c0_i32_0 : i32, i32
  }
  func.func @transform_2(%arg0: i32) -> (i32, i32) {
    %c0_i32 = arith.constant 0 : i32
    %c0_i32_0 = arith.constant 0 : i32
    %c0_i32_1 = arith.constant 0 : i32
    return %c0_i32, %c0_i32_0 : i32, i32
  }
  func.func @transform_3(%arg0: i32) -> (i32, i32) {
    %c0_i32 = arith.constant 0 : i32
    %c0_i32_0 = arith.constant 0 : i32
    return %arg0, %c0_i32 : i32, i32
  }
}

</mosaic_0001>

<bundles_post_ra>
// kernel: tpu_custom_call.1
= control target key start
LH: loop header
LB: loop body
LE: loop exit
PB: predicated region body
PF: predicated region fallthrough
CT: control target
= control target key end

     0   :  { %8 = vsyncpa [#allocation3], 0  ;;  %s225_s0 = inlined_call_operand.hbm [shape: bf16[2,16], index: 0, kind: input, shape index: {}]   ;;  %s226_s1 = inlined_call_operand.hbm [shape: bf16[16,128], index: 1, kind: input, shape index: {}]   ;;  %s227_s2 = inlined_call_operand.vmem [shape: f32[1,128], index: 2, kind: input, shape index: {}]   ;;  %s228_s3 = inlined_call_operand.hbm [shape: f32[2,128], index: 3, kind: output, shape index: {}]  }
   0x1   :  { %9 = vsyncpa [#allocation6], 0 }
   0x2   :  { %10 = vsyncpa [#allocation4], 0  ;;  %s16_s14 = sshll.u32 %s225_s0, 4  ;;  %s188_s15 = smov [#allocation2]   ;;  %s17_s14 = int_to_ptr.hbm [resolvable:$true] %s16_s14 }
   0x3   :  { %s18_s16 = sshll.u32 %s188_s15, 4  ;;  %s26_s19 = sshll.u32 %s226_s1, 4  ;;  %s19_s16 = int_to_ptr.vmem [resolvable:$true] %s18_s16  ;;  %s27_s19 = int_to_ptr.hbm [resolvable:$true] %s26_s19 }
   0x4   :  { %21 = dma.hbm_to_vmem [thread:$0]  %s17_s14, 16, %s19_s16, [#allocation3]  }
   0x5   :  { %s189_s20 = smov [#allocation5]   ;;  %s190_s22 = smov 64  }
   0x6   :  { %s28_s21 = sshll.u32 %s189_s20, 4  ;;  %s191_s23 = smov 4   ;;  %s29_s21 = int_to_ptr.vmem [resolvable:$true] %s28_s21 }
   0x7   :  { %34 = dma.hbm_to_vmem [thread:$0]  %s27_s19, 128, %s29_s21, [#allocation6], %s190_s22, %s190_s22, %s191_s23  }
   0x8   :  { %182 = dma.done.wait [#allocation3], 16  }
   0x9   :  { %183 = vsyncadd [#allocation3], 4294967280 }
   0xa   :  { %184 = dma.done.wait [#allocation6], 128  }
   0xb   :  { %185 = vsyncadd [#allocation6], 4294967168  ;;  %v101_v0 = vld [vmem:[#allocation5] sm:$0xff]  ;;  %v46_v1 = vld [vmem:[#allocation2] sm:$0x1]  ;;  %vm59_vm0 = vcmask 130048  }
   0xc   :  { %70 = vmatpush.bf16.msra.mxu0 %v101_v0  ;;  %v107_v2 = vld [vmem:[%s227_s2] ss:$0 sm:$0xff]  ;;  %s192_s1 = smov [#allocation7]   ;;  %s85_s28 = sshll.u32 %s228_s3, 4  ;;  %s86_s28 = int_to_ptr.hbm [resolvable:$true] %s85_s28 }
   0xd   :  { %s83_s25 = sshll.u32 %s192_s1, 4  ;;  %s84_s25 = int_to_ptr.vmem [resolvable:$true] %s83_s25 }
   0xf   :  { %100 = vmatmul.msk.bf16.vlgmr.msra.gmra.mxu0 %vm59_vm0, %v46_v1 }
  0x8c   :  { %v72_v3 = vpop.f32.mrf.mxu0 }
  0x8d   :  { %v73_v4 = vadd.f32 %v107_v2, %v72_v3 }
  0x8f   :  { %108 = vtanh.f32 %v73_v4 }
  0x94   :  { %v74_v5 = vpop.f32.mrf.mxu0 }
  0x95   :  { %v109_v6 = vpop.eup %108 }
  0x96   :  { %77 = vst [vmem:[#allocation7] sm:$0x3] %v109_v6 }
  0x97   :  { %88 = dma.vmem_to_hbm [thread:$0]  %s84_s25, 32, %s86_s28, [#allocation4]  }
  0x98   :  { %186 = dma.done.wait [#allocation4], 32  }
  0x99   :  { %187 = vsyncadd [#allocation4], 4294967264 }
  0x9a   :  { %93 = vsyncpa [#allocation3], 1 }
  0x9b   :  { %94 = vsyncpa [#allocation6], 1 }
  0x9c   :  { %95 = vsyncpa [#allocation4], 1 }

</bundles_post_ra>
